<compile_context>
chip_gen: v7x
topology: tpu7x:2x2x1
jax: 0.10.0
libtpu: 0.0.40
codegen_flags: <defaults>
</compile_context>

<pallas_src>
import jax
import jax.numpy as jnp
import numpy as np
from jax.experimental import pallas as pl
from jax.experimental.pallas import tpu as pltpu

LANE = 128
SUBLANE = 8
MAX_BLOCK_ROWS = 2048          # 2048 * 128 * 4 B = 1 MiB per f32 block buffer


# --------------------------------------------------------------------------- #
# Kernels
# --------------------------------------------------------------------------- #
def _lowpass_step_kernel(scalars_ref, i_prev_ref, spikes_ref, out_ref):
    """One time step on one (BLOCK_ROWS, 128) tile."""
    inv_tau = scalars_ref[0]          # 1/tau          (f32, SMEM)
    c0 = scalars_ref[1]               # 1 - 1/tau      (f32, SMEM)
    s = spikes_ref[...].astype(jnp.float32)
    i_prev = i_prev_ref[...].astype(jnp.float32)
    # I(t) = I(t-1) * (c0 + S * inv_tau) + S
    out_ref[...] = (i_prev * (c0 + s * inv_tau) + s).astype(out_ref.dtype)


def _lowpass_seq_kernel(scalars_ref, i0_ref, spikes_ref, out_ref, state_ref):
    """T fused time steps; I(t) stays resident in VMEM scratch across t."""
    t = pl.program_id(1)
    inv_tau = scalars_ref[0]
    c0 = scalars_ref[1]

    @pl.when(t == 0)
    def _():
        state_ref[...] = i0_ref[...].astype(jnp.float32)

    s = spikes_ref[0].astype(jnp.float32)
    i_new = state_ref[...] * (c0 + s * inv_tau) + s
    state_ref[...] = i_new
    out_ref[0] = i_new.astype(out_ref.dtype)


# --------------------------------------------------------------------------- #
# Layout helpers (lane-dense slabs)
# --------------------------------------------------------------------------- #
def _round_up(x, m):
    return ((x + m - 1) // m) * m


def _slab_layout(n):
    """Padded row count and block-row count for n flattened elements."""
    rows = max(1, -(-n // LANE))
    if rows <= MAX_BLOCK_ROWS:
        block_rows = _round_up(rows, SUBLANE)
        rows_padded = block_rows
    else:
        block_rows = MAX_BLOCK_ROWS
        rows_padded = _round_up(rows, block_rows)
    return rows_padded, block_rows


def _to_slab(x, rows_padded):
    flat = x.reshape(-1)
    n = flat.shape[0]
    n_pad = rows_padded * LANE
    if n_pad != n:
        flat = jnp.pad(flat, (0, n_pad - n))
    return flat.reshape(rows_padded, LANE)


def _to_slab_seq(x2d, rows_padded):
    t, n = x2d.shape
    n_pad = rows_padded * LANE
    if n_pad != n:
        x2d = jnp.pad(x2d, ((0, 0), (0, n_pad - n)))
    return x2d.reshape(t, rows_padded, LANE)


def _from_slab(slab, n, shape):
    return slab.reshape(-1)[:n].reshape(shape)


def _scalar_params(inv_tau):
    """(1/tau, 1 - 1/tau) as a float32 vector for SMEM (no host sync)."""
    inv_tau = jnp.asarray(inv_tau, dtype=jnp.float32).reshape(-1)[0]
    return jnp.stack([inv_tau, jnp.float32(1.0) - inv_tau])


def _as_float(x):
    x = jnp.asarray(x)
    if not jnp.issubdtype(x.dtype, jnp.floating):
        x = x.astype(jnp.float32)
    return x


# --------------------------------------------------------------------------- #
# pallas_call wrappers
# --------------------------------------------------------------------------- #
def _lowpass_step_slab(scalars, state_slab, spikes_slab, block_rows):
    rows = state_slab.shape[0]
    n_tiles = rows // block_rows
    return pl.pallas_call(
        _lowpass_step_kernel,
        out_shape=jax.ShapeDtypeStruct((rows, LANE), state_slab.dtype),
        grid=(n_tiles,),
        in_specs=[
            pl.BlockSpec(memory_space=pltpu.SMEM),                 # (1/tau, 1-1/tau)
            pl.BlockSpec((block_rows, LANE), lambda r: (r, 0)),    # I(t-1)
            pl.BlockSpec((block_rows, LANE), lambda r: (r, 0)),    # S(t)
        ],
        out_specs=pl.BlockSpec((block_rows, LANE), lambda r: (r, 0)),
        input_output_aliases={1: 0},          # reuse the state buffer in place
        compiler_params=pltpu.CompilerParams(
            dimension_semantics=("parallel",)),
    )(scalars, state_slab, spikes_slab)


def _lowpass_seq_slab(scalars, i0_slab, spikes_slab, block_rows):
    t_steps, rows, _ = spikes_slab.shape
    n_tiles = rows // block_rows
    return pl.pallas_call(
        _lowpass_seq_kernel,
        out_shape=jax.ShapeDtypeStruct((t_steps, rows, LANE), spikes_slab.dtype),
        grid=(n_tiles, t_steps),              # T innermost: recurrence axis
        in_specs=[
            pl.BlockSpec(memory_space=pltpu.SMEM),                        # scalars
            pl.BlockSpec((block_rows, LANE), lambda r, t: (r, 0)),        # I(0)
            pl.BlockSpec((1, block_rows, LANE), lambda r, t: (t, r, 0)),  # S(t)
        ],
        out_specs=pl.BlockSpec((1, block_rows, LANE), lambda r, t: (t, r, 0)),
        scratch_shapes=[pltpu.VMEM((block_rows, LANE), jnp.float32)],
        compiler_params=pltpu.CompilerParams(
            dimension_semantics=("parallel", "arbitrary")),
    )(scalars, i0_slab, spikes_slab)


def lowpass_sequence(spikes_seq, inv_tau, initial_state=None):
    """Fused T-step LowPassSynapse. spikes_seq: (T, *shape) -> (T, *shape)."""
    spikes_seq = _as_float(spikes_seq)
    t_steps = spikes_seq.shape[0]
    step_shape = spikes_seq.shape[1:]
    n = int(np.prod(step_shape))
    rows, block_rows = _slab_layout(n)
    s_slab = _to_slab_seq(spikes_seq.reshape(t_steps, n), rows)
    if initial_state is None:
        i0_slab = jnp.zeros((rows, LANE), spikes_seq.dtype)
    else:
        i0_slab = _to_slab(jnp.asarray(initial_state, spikes_seq.dtype), rows)
    out_slab = _lowpass_seq_slab(_scalar_params(inv_tau), i0_slab, s_slab,
                                 block_rows)
    return out_slab.reshape(t_steps, rows * LANE)[:, :n].reshape(
        (t_steps,) + step_shape)


# --------------------------------------------------------------------------- #
# Module wrapper
# --------------------------------------------------------------------------- #
class LowPassSynapse:
    """Stateful wrapper mirroring the PyTorch module (per-step __call__),
    plus a fused multi-step path (forward_sequence)."""

    def __init__(self, tau: float = 100.0, learnable: bool = False):
        if learnable:
            # nn.Parameter(torch.ones(1) / tau): keep as a device array so
            # forward never forces a device->host sync.
            # TODO(synk): gradient path through learnable tau is not wired
            # (forward values only; no custom_vjp).
            self.tau = jnp.ones((1,), dtype=jnp.float32) / tau
        else:
            self.tau = 1.0 / tau
        self._state_slab = None
        self._layout = None

    # -- helpers -------------------------------------------------------------
    def _scalars(self):
        return _scalar_params(self.tau)

    def _ensure_state(self, n, dtype):
        rows, block_rows = _slab_layout(n)
        layout = (n, rows, block_rows, jnp.dtype(dtype))
        if self._state_slab is None or self._layout != layout:
            self._state_slab = jnp.zeros((rows, LANE), dtype)
            self._layout = layout
        return rows, block_rows

    # -- PyTorch-style single-step forward ------------------------------------
    def __call__(self, in_spikes):
        in_spikes = _as_float(in_spikes)
        shape = in_spikes.shape
        n = int(np.prod(shape))
        rows, block_rows = self._ensure_state(n, in_spikes.dtype)
        s_slab = _to_slab(in_spikes, rows)
        self._state_slab = _lowpass_step_slab(
            self._scalars(), self._state_slab, s_slab, block_rows)
        return _from_slab(self._state_slab, n, shape)

    # -- fused multi-step forward ---------------------------------------------
    def forward_sequence(self, spikes_seq):
        spikes_seq = _as_float(spikes_seq)
        t_steps = spikes_seq.shape[0]
        step_shape = spikes_seq.shape[1:]
        n = int(np.prod(step_shape))
        rows, block_rows = self._ensure_state(n, spikes_seq.dtype)
        s_slab = _to_slab_seq(spikes_seq.reshape(t_steps, n), rows)
        out_slab = _lowpass_seq_slab(
            self._scalars(), self._state_slab, s_slab, block_rows)
        self._state_slab = out_slab[-1]
        return out_slab.reshape(t_steps, rows * LANE)[:, :n].reshape(
            (t_steps,) + step_shape)

    def reset(self):
        self._state_slab = None
        self._layout = None


# --------------------------------------------------------------------------- #
# Self-test
# --------------------------------------------------------------------------- #
if __name__ == "__main__":
    key = jax.random.PRNGKey(0)
    B, C, H, W = 2, 4, 16, 16      # NCHW spike feature map
    T = 8                          # time steps
    tau = 10.0

    keys = jax.random.split(key, T)
    spikes_seq = [
        (jax.random.uniform(k, (B, C, H, W)) >= 0.7).astype(jnp.float32)
        for k in keys
    ]

    # NumPy reference of the recurrence.
    inv_tau = 1.0 / tau
    ref_states = []
    ref = np.zeros((B, C, H, W), dtype=np.float32)
    for t in range(T):
        s = np.asarray(spikes_seq[t])
        ref = ref - (1.0 - s) * ref * inv_tau + s
        ref_states.append(ref.copy())

    # 1) Stateful per-step path (matches the PyTorch calling convention).
    lp = LowPassSynapse(tau=tau)
    outs = [lp(spikes_seq[t]) for t in range(T)]
    outs = jax.block_until_ready(outs)
    for t in range(T):
        np.testing.assert_allclose(np.asarray(outs[t]), ref_states[t],
                                   rtol=1e-6, atol=1e-6)
    assert outs[-1].shape == (B, C, H, W)

    # 2) Fused T-step kernel (state resident in VMEM across time).
    stacked = jnp.stack(spikes_seq)                       # (T, B, C, H, W)
    fused = jax.block_until_ready(lowpass_sequence(stacked, 1.0 / tau))
    assert fused.shape == (T, B, C, H, W)
    for t in range(T):
        np.testing.assert_allclose(np.asarray(fused[t]), ref_states[t],
                                   rtol=1e-6, atol=1e-6)

    # 3) Class-level fused forward for the first half, then continue stepping.
    lp2 = LowPassSynapse(tau=tau)
    _ = lp2.forward_sequence(stacked[: T // 2])
    last = None
    for t in range(T // 2, T):
        last = lp2(spikes_seq[t])
    last = jax.block_until_ready(last)
    np.testing.assert_allclose(np.asarray(last), ref_states[-1],
                               rtol=1e-6, atol=1e-6)

    print("KERNEL_OK")
</pallas_src>

<mosaic_0001>
module attributes {stable_mosaic.version = 11 : i64} {
  func.func @_lowpass_step_kernel(%arg0: i32, %arg1: memref<2xf32, #tpu.memory_space<smem>>, %arg2: memref<16x128xf32, #tpu.memory_space<vmem>>, %arg3: memref<16x128xf32, #tpu.memory_space<vmem>>, %arg4: memref<16x128xf32, #tpu.memory_space<vmem>>) attributes {dimension_semantics = [#tpu.dimension_semantics<parallel>], iteration_bounds = array<i64: 1>, scalar_prefetch = 0 : i64, scratch_operands = 0 : i64, tpu.core_type = #tpu.core_type<tc>, window_params = [{transform_indices = @transform_0, window_bounds = array<i64: 2>}, {transform_indices = @transform_1, window_bounds = array<i64: 16, 128>}, {transform_indices = @transform_2, window_bounds = array<i64: 16, 128>}, {transform_indices = @transform_3, window_bounds = array<i64: 16, 128>}]} {
    %c0 = arith.constant 0 : index
    %0 = memref.load %arg1[%c0] : memref<2xf32, #tpu.memory_space<smem>>
    %c1 = arith.constant 1 : index
    %1 = memref.load %arg1[%c1] : memref<2xf32, #tpu.memory_space<smem>>
    %c0_0 = arith.constant 0 : index
    %c0_1 = arith.constant 0 : index
    %2 = vector.load %arg3[%c0_0, %c0_1] : memref<16x128xf32, #tpu.memory_space<vmem>>, vector<16x128xf32>
    %c0_2 = arith.constant 0 : index
    %c0_3 = arith.constant 0 : index
    %3 = vector.load %arg2[%c0_2, %c0_3] : memref<16x128xf32, #tpu.memory_space<vmem>>, vector<16x128xf32>
    %4 = vector.broadcast %0 : f32 to vector<16x128xf32>
    %5 = arith.mulf %2, %4 : vector<16x128xf32>
    %6 = vector.broadcast %1 : f32 to vector<16x128xf32>
    %7 = arith.addf %6, %5 : vector<16x128xf32>
    %8 = arith.mulf %3, %7 : vector<16x128xf32>
    %9 = arith.addf %8, %2 : vector<16x128xf32>
    %c0_4 = arith.constant 0 : index
    %c0_5 = arith.constant 0 : index
    %10 = vector.load %arg4[%c0_4, %c0_5] : memref<16x128xf32, #tpu.memory_space<vmem>>, vector<16x128xf32>
    tpu.vector_store %arg4[%c0_4, %c0_5], %9 {strides = array<i32>} : memref<16x128xf32, #tpu.memory_space<vmem>>, vector<16x128xf32>,
    return
  }
  func.func @transform_0(%arg0: i32) -> i32 {
    %c0_i32 = arith.constant 0 : i32
    %c0_i32_0 = arith.constant 0 : i32
    return %c0_i32 : i32
  }
  func.func @transform_1(%arg0: i32) -> (i32, i32) {
    %c0_i32 = arith.constant 0 : i32
    %c0_i32_0 = arith.constant 0 : i32
    return %arg0, %c0_i32 : i32, i32
  }
  func.func @transform_2(%arg0: i32) -> (i32, i32) {
    %c0_i32 = arith.constant 0 : i32
    %c0_i32_0 = arith.constant 0 : i32
    return %arg0, %c0_i32 : i32, i32
  }
  func.func @transform_3(%arg0: i32) -> (i32, i32) {
    %c0_i32 = arith.constant 0 : i32
    %c0_i32_0 = arith.constant 0 : i32
    return %arg0, %c0_i32 : i32, i32
  }
}

</mosaic_0001>

<bundles_post_ra>
// kernel: tpu_custom_call.1
= control target key start
LH: loop header
LB: loop body
LE: loop exit
PB: predicated region body
PF: predicated region fallthrough
CT: control target
= control target key end

     0   :  { %8 = vsyncpa [#allocation5], 0  ;;  %s210_s0 = inlined_call_operand.vmem [shape: f32[2], index: 0, kind: input, shape index: {}]   ;;  %s211_s1 = inlined_call_operand.hbm [shape: f32[16,128], index: 1, kind: input, shape index: {}, may-alias: {1,3}]   ;;  %s212_s2 = inlined_call_operand.vmem [shape: f32[16,128], index: 2, kind: input, shape index: {}]   ;;  %s213_s3 = inlined_call_operand.hbm [shape: f32[16,128], index: 3, kind: output, shape index: {}, may-alias: {1,3}]  }
   0x1   :  { %9 = vsyncpa [#allocation3], 0 }
   0x2   :  { %10 = vsyncpa [#allocation4], 0  ;;  %s17_s14 = sshll.u32 %s210_s0, 4  ;;  %s18_s14 = int_to_ptr.vmem [resolvable:$true] %s17_s14 }
   0x3   :  { %s84_s15 = scalar_lea.vmem %s18_s14, 16  ;;  %p89_p1 = scmp.lt.s32.totalorder %s18_s14, %s18_s14 }
   0x4   :  { %p85_p0 = scmp.ne.s32.totalorder %s18_s14, %s84_s15  ;;  %p90_p2 = scmp.lt.s32.totalorder %s84_s15, %s84_s15 }
   0x6   :  { %p91_p3 = por %p90_p2, %p89_p1 }
   0x8   :  { %p92_p4 = pnand %p91_p3, %p85_p0 }
   0xa   :  { %95 = shalt.err (!%p92_p4)
}
   0xb   :  { %s146_s16 = smov [#allocation2]   ;;  %s147_s17 = smov [#allocation6]  }
   0xc   :  { %20 = dma.vmem_to_smem %s18_s14, 16, %s146_s16, [#allocation5]  }
   0xd   :  { %s26_s18 = sshll.u32 %s147_s17, 4  ;;  %s96_s21 = scalar_lea.hbm %s211_s1, 256  ;;  %s27_s18 = int_to_ptr.vmem [resolvable:$true] %s26_s18 }
   0xe   :  { %p97_p5 = scmp.ne.s32.totalorder %s211_s1, %s96_s21  ;;  %p100_p6 = scmp.lt.u32.totalorder %s96_s21, %s211_s1 }
  0x10   :  { %p102_p7 = pnand %p100_p6, %p97_p5 }
  0x12   :  { %105 = shalt.err (!%p102_p7)
}
  0x13   :  { %s106_s25 = scalar_lea.vmem %s27_s18, 256  ;;  %p111_p9 = scmp.lt.s32.totalorder %s27_s18, %s27_s18 }
  0x14   :  { %p107_p8 = scmp.ne.s32.totalorder %s27_s18, %s106_s25  ;;  %p112_p10 = scmp.lt.s32.totalorder %s106_s25, %s106_s25 }
  0x16   :  { %p113_p11 = por %p112_p10, %p111_p9 }
  0x18   :  { %p114_p12 = pnand %p113_p11, %p107_p8 }
  0x1a   :  { %117 = shalt.err (!%p114_p12)
}
  0x1b   :  { %s148_s26 = smov 128   ;;  %s149_s27 = smov 8  }
  0x1c   :  { %32 = dma.hbm_to_vmem [thread:$0]  %s211_s1, 256, %s27_s18, [#allocation3], %s148_s26, %s148_s26, %s149_s27  }
  0x1d   :  { %140 = dma.done.wait [#allocation5], 16  }
  0x1e   :  { %141 = vsyncadd [#allocation5], 4294967280 }
  0x1f   :  { %142 = dma.done.wait [#allocation3], 256  }
  0x20   :  { %143 = vsyncadd [#allocation3], 4294967040 }
  0x21   :  { %41 = sfence }
  0x22   :  { %s42_s30 = sld [smem:[#allocation2]]  ;;  %s78_s4 = sld [smem:[#allocation2 + $0x1]]  ;;  %v44_v0 = vld [vmem:[%s212_s2] sm:$0xff]  ;;  %v45_v1 = vld [vmem:[%s212_s2 + $0x8] sm:$0xff] }
  0x23   :  { %v46_v6 = vld [vmem:[#allocation6] sm:$0xff]  ;;  %v47_v7 = vld [vmem:[#allocation6 + $0x8] sm:$0xff]  ;;  %s150_s1 = smov [#allocation7]  }
  0x24   :  { %s65_s9 = sshll.u32 %s150_s1, 4  ;;  %s66_s9 = int_to_ptr.vmem [resolvable:$true] %s65_s9 }
  0x25   :  { %s118_s10 = scalar_lea.vmem %s66_s9, 256  ;;  %p123_p0 = scmp.lt.s32.totalorder %s66_s9, %s66_s9 }
  0x26   :  { %p119_p13 = scmp.ne.s32.totalorder %s66_s9, %s118_s10  ;;  %p124_p1 = scmp.lt.s32.totalorder %s118_s10, %s118_s10 }
  0x28   :  { %v48_v2 = vstv %s42_s30  ;;  %v51_v3 = vstv %s78_s4  ;;  %p125_p2 = por %p124_p1, %p123_p0 }
  0x29   :  { %v49_v4 = vmul.f32 %v48_v2, %v44_v0  ;;  %v50_v5 = vmul.f32 %v48_v2, %v45_v1 }
  0x2a   :  { %p126_p3 = pnand %p125_p2, %p119_p13 }
  0x2b   :  { %v52_v8 = vadd.f32 %v51_v3, %v49_v4  ;;  %v53_v9 = vadd.f32 %v51_v3, %v50_v5 }
  0x2d   :  { %v54_v10 = vmul.f32 %v52_v8, %v46_v6  ;;  %v55_v11 = vmul.f32 %v53_v9, %v47_v7 }
  0x2f   :  { %v56_v12 = vadd.f32 %v54_v10, %v44_v0  ;;  %v57_v13 = vadd.f32 %v55_v11, %v45_v1 }
  0x31   :  { %58 = vst [vmem:[#allocation7] sm:$0xff] %v56_v12  ;;  %59 = vst [vmem:[#allocation7 + $0x8] sm:$0xff] %v57_v13 }
  0x32   :  { %129 = shalt.err (!%p126_p3)
}
  0x33   :  { %s130_s12 = scalar_lea.hbm %s213_s3, 256 }
  0x34   :  { %p131_p4 = scmp.ne.s32.totalorder %s213_s3, %s130_s12  ;;  %p134_p5 = scmp.lt.u32.totalorder %s130_s12, %s213_s3 }
  0x36   :  { %p136_p6 = pnand %p134_p5, %p131_p4 }
  0x38   :  { %139 = shalt.err (!%p136_p6)
}
  0x39   :  { %71 = dma.vmem_to_hbm [thread:$0]  %s66_s9, 256, %s213_s3, [#allocation4], %s148_s26, %s148_s26, %s149_s27  }
  0x3a   :  { %144 = dma.done.wait [#allocation4], 256  }
  0x3b   :  { %145 = vsyncadd [#allocation4], 4294967040 }
  0x3c   :  { %75 = vsyncpa [#allocation3], 1 }
  0x3d   :  { %76 = vsyncpa [#allocation4], 1 }
  0x3e   :  { %77 = vsyncpa [#allocation5], 1 }

</bundles_post_ra>
